<compile_context>
chip_gen: v5e
topology: v5e:2x2
jax: 0.10.0
libtpu: 0.0.40
codegen_flags: <defaults>
</compile_context>

<pallas_src>
import functools
import math

import numpy as np
import jax
import jax.numpy as jnp
from jax.experimental import pallas as pl
from jax.experimental.pallas import tpu as pltpu

_INV_SQRT2 = 0.7071067811865476


def _gelu(x):
    # exact (erf-based) GELU, matching torch.nn.GELU() default
    return 0.5 * x * (1.0 + jax.lax.erf(x * _INV_SQRT2))


def _swish(x):
    return x * jax.nn.sigmoid(x)


def _layernorm(x, g, b, eps=1e-5):
    mu = jnp.mean(x, axis=-1, keepdims=True)
    var = jnp.mean((x - mu) ** 2, axis=-1, keepdims=True)
    return (x - mu) * jax.lax.rsqrt(var + eps) * g + b


# ---------------------------------------------------------------------------
# Kernels
# ---------------------------------------------------------------------------
def _proj_kernel(x_ref, w_ref, b_ref, o_ref):
    """channel_proj: Linear -> (Dropout) -> GELU, rows = (bb*L)."""
    xb = x_ref[...]                                   # (bb, L, E)
    bb, L, E = xb.shape
    D = w_ref.shape[1]
    x2 = xb.reshape(bb * L, E)
    y = _gelu(jnp.dot(x2, w_ref[...], preferred_element_type=jnp.float32)
              + b_ref[...])
    o_ref[...] = y.reshape(bb, L, D).astype(o_ref.dtype)


def _layer_kernel(x_ref, ln1w_ref, ln1b_ref, wq_ref, wk_ref, wv_ref, wg_ref,
                  gnw_ref, gnb_ref, wo_ref, ln2w_ref, ln2b_ref,
                  w1_ref, b1_ref, w2_ref, b2_ref, o_ref,
                  *, heads, hd, hv, gammas):
    """One fused encoder layer: LN1 + MSR + residual + LN2 + FFN + residual."""
    xb = x_ref[...]                                   # (bb, L, D)
    bb, L, D = xb.shape
    x2 = xb.reshape(bb * L, D).astype(jnp.float32)    # (N, D) rows on sublanes

    # ---- LayerNorm 1 ------------------------------------------------------
    xn = _layernorm(x2, ln1w_ref[...], ln1b_ref[...])

    # ---- Multi-scale retention: head-batched projections --------------------
    q = jnp.dot(xn, wq_ref[...], preferred_element_type=jnp.float32)  # (N, H*hd)
    k = jnp.dot(xn, wk_ref[...], preferred_element_type=jnp.float32)  # (N, H*hd)
    v = jnp.dot(xn, wv_ref[...], preferred_element_type=jnp.float32)  # (N, H*hv)
    gate = _swish(jnp.dot(xn, wg_ref[...],
                          preferred_element_type=jnp.float32))        # (N, vdim)

    q3 = q.reshape(bb, L, heads * hd)
    k3 = k.reshape(bb, L, heads * hd)
    v3 = v.reshape(bb, L, heads * hv)

    gnw = gnw_ref[...]                                # (1, vdim)
    gnb = gnb_ref[...]
    wo = wo_ref[...]                                  # (vdim, D)

    # Decay mask generated on the fly (no HBM traffic, no VMEM residency).
    n_i = jax.lax.broadcasted_iota(jnp.float32, (L, L), 0)
    m_i = jax.lax.broadcasted_iota(jnp.float32, (L, L), 1)
    diff = n_i - m_i
    causal = diff >= 0.0
    safe = jnp.maximum(diff, 0.0)

    acc = jnp.zeros((bb * L, D), jnp.float32)
    for h in range(heads):                            # static unroll, heads is small
        log_g = math.log(gammas[h])
        dmask = jnp.where(causal, jnp.exp(safe * log_g), 0.0)          # (L, L)
        qh = q3[:, :, h * hd:(h + 1) * hd]
        kh = k3[:, :, h * hd:(h + 1) * hd]
        vh = v3[:, :, h * hv:(h + 1) * hv]
        s = jnp.einsum('bld,bmd->blm', qh, kh,
                       preferred_element_type=jnp.float32) * dmask[None]
        r = jnp.einsum('blm,bmv->blv', s, vh,
                       preferred_element_type=jnp.float32)
        r2 = r.reshape(bb * L, hv)
        # GroupNorm(heads, v_dim): per-token, per-head statistics.
        mu = jnp.mean(r2, axis=-1, keepdims=True)
        var = jnp.mean((r2 - mu) ** 2, axis=-1, keepdims=True)
        rn = (r2 - mu) * jax.lax.rsqrt(var + 1e-5)
        yh = rn * gnw[:, h * hv:(h + 1) * hv] + gnb[:, h * hv:(h + 1) * hv]
        gy = gate[:, h * hv:(h + 1) * hv] * yh
        # Accumulate through this head's row-block of W_O (avoids concat of
        # 8-lane head slices; accumulator is lane-dense over D).
        acc = acc + jnp.dot(gy, wo[h * hv:(h + 1) * hv, :],
                            preferred_element_type=jnp.float32)

    y = acc + x2                                      # residual 1

    # ---- LayerNorm 2 + FFN --------------------------------------------------
    yn = _layernorm(y, ln2w_ref[...], ln2b_ref[...])
    hmid = _gelu(jnp.dot(yn, w1_ref[...], preferred_element_type=jnp.float32)
                 + b1_ref[...])
    out = (jnp.dot(hmid, w2_ref[...], preferred_element_type=jnp.float32)
           + b2_ref[...] + y)                         # residual 2
    o_ref[...] = out.reshape(bb, L, D).astype(o_ref.dtype)


def _tail_kernel(x_ref, w1_ref, b1_ref, w2_ref, b2_ref,
                 tw1_ref, tb1_ref, tw2_ref, tb2_ref, o_ref):
    """channel_proj_invers + temp_proj fused; contracts the seq axis in-kernel."""
    xb = x_ref[...]                                   # (bb, L, D)
    bb, L, D = xb.shape
    x2 = xb.reshape(bb * L, D)
    h = _gelu(jnp.dot(x2, w1_ref[...], preferred_element_type=jnp.float32)
              + b1_ref[...])
    c = jnp.dot(h, w2_ref[...], preferred_element_type=jnp.float32) + b2_ref[...]
    E = c.shape[-1]
    c3 = c.reshape(bb, L, E)

    tw1 = tw1_ref[...]                                # (L, F)
    tb1 = tb1_ref[...]                                # (1, F)
    tw2 = tw2_ref[...]                                # (F, P)
    tb2 = tb2_ref[...]                                # (1, P)

    for b in range(bb):                               # static unroll (small batch block)
        cb = c3[b]                                    # (L, E)
        # Contract the sequence axis directly (transposed-LHS matmul) --
        # equivalent to Linear(seq_len, d_ff) on X.transpose(2, 1).
        t1 = jax.lax.dot_general(cb, tw1, (((0,), (0,)), ((), ())),
                                 preferred_element_type=jnp.float32)    # (E, F)
        t1 = _gelu(t1 + tb1)
        t2 = jnp.dot(t1, tw2, preferred_element_type=jnp.float32) + tb2  # (E, P)
        o_ref[b] = t2.astype(o_ref.dtype)


# ---------------------------------------------------------------------------
# pallas_call wrappers
# ---------------------------------------------------------------------------
_CP = pltpu.CompilerParams(dimension_semantics=("parallel",))
# NOTE: at these shapes the fused layer fits the default scoped VMEM on every
# generation; for large d_model/L raise vmem_limit_bytes here (esp. on v5e).


def _batch_block(B, cap=8):
    """Whole batch in one grid step for small B, otherwise divisor chunks."""
    return B if B <= cap else math.gcd(B, cap)


def channel_proj(x, w, b):
    B, L, E = x.shape
    D = w.shape[1]
    bb = _batch_block(B)
    return pl.pallas_call(
        _proj_kernel,
        out_shape=jax.ShapeDtypeStruct((B, L, D), x.dtype),
        grid=(B // bb,),
        in_specs=[pl.BlockSpec((bb, L, E), lambda i: (i, 0, 0)),
                  pl.BlockSpec((E, D), lambda i: (0, 0)),
                  pl.BlockSpec((1, D), lambda i: (0, 0))],
        out_specs=pl.BlockSpec((bb, L, D), lambda i: (i, 0, 0)),
        compiler_params=_CP,
    )(x, w, b.reshape(1, D))


def encoder_layer(x, lp, heads, gammas):
    B, L, D = x.shape
    hqk = lp["wq"].shape[1]
    hd = hqk // heads
    vdim = lp["wv"].shape[1]
    hv = vdim // heads
    dff = lp["ffn_w1"].shape[1]
    bb = _batch_block(B)

    kernel = functools.partial(_layer_kernel, heads=heads, hd=hd, hv=hv,
                               gammas=tuple(float(g) for g in gammas))

    def full2d(shape):
        return pl.BlockSpec(shape, lambda i: (0, 0))

    return pl.pallas_call(
        kernel,
        out_shape=jax.ShapeDtypeStruct((B, L, D), x.dtype),
        grid=(B // bb,),
        in_specs=[pl.BlockSpec((bb, L, D), lambda i: (i, 0, 0)),
                  full2d((1, D)), full2d((1, D)),                 # ln1 w, b
                  full2d((D, hqk)), full2d((D, hqk)),             # wq, wk
                  full2d((D, vdim)), full2d((D, vdim)),           # wv, wg
                  full2d((1, vdim)), full2d((1, vdim)),           # gn w, b
                  full2d((vdim, D)),                              # wo
                  full2d((1, D)), full2d((1, D)),                 # ln2 w, b
                  full2d((D, dff)), full2d((1, dff)),             # ffn1 w, b
                  full2d((dff, D)), full2d((1, D))],              # ffn2 w, b
        out_specs=pl.BlockSpec((bb, L, D), lambda i: (i, 0, 0)),
        compiler_params=_CP,
    )(x,
      lp["ln1_w"].reshape(1, D), lp["ln1_b"].reshape(1, D),
      lp["wq"], lp["wk"], lp["wv"], lp["wg"],
      lp["gn_w"].reshape(1, vdim), lp["gn_b"].reshape(1, vdim),
      lp["wo"],
      lp["ln2_w"].reshape(1, D), lp["ln2_b"].reshape(1, D),
      lp["ffn_w1"], lp["ffn_b1"].reshape(1, dff),
      lp["ffn_w2"], lp["ffn_b2"].reshape(1, D))


def tail_proj(x, p):
    B, L, D = x.shape
    E = p["cpi_w2"].shape[1]
    F = p["tp_w1"].shape[1]
    P = p["tp_w2"].shape[1]
    bb = _batch_block(B)
    out = pl.pallas_call(
        _tail_kernel,
        out_shape=jax.ShapeDtypeStruct((B, E, P), x.dtype),
        grid=(B // bb,),
        in_specs=[pl.BlockSpec((bb, L, D), lambda i: (i, 0, 0)),
                  pl.BlockSpec((D, D), lambda i: (0, 0)),
                  pl.BlockSpec((1, D), lambda i: (0, 0)),
                  pl.BlockSpec((D, E), lambda i: (0, 0)),
                  pl.BlockSpec((1, E), lambda i: (0, 0)),
                  pl.BlockSpec((L, F), lambda i: (0, 0)),
                  pl.BlockSpec((1, F), lambda i: (0, 0)),
                  pl.BlockSpec((F, P), lambda i: (0, 0)),
                  pl.BlockSpec((1, P), lambda i: (0, 0))],
        out_specs=pl.BlockSpec((bb, E, P), lambda i: (i, 0, 0)),
        compiler_params=_CP,
    )(x,
      p["cpi_w1"], p["cpi_b1"].reshape(1, D),
      p["cpi_w2"], p["cpi_b2"].reshape(1, E),
      p["tp_w1"], p["tp_b1"].reshape(1, F),
      p["tp_w2"], p["tp_b2"].reshape(1, P))
    return jnp.transpose(out, (0, 2, 1))              # (B, pred_len, enc_in)


# ---------------------------------------------------------------------------
# Model glue / parameters
# ---------------------------------------------------------------------------
def init_params(key, enc_in, d_model, d_ff, heads, layers, seq_len, pred_len):
    hd = d_model // heads
    vdim = d_model                                    # double_v_dim=False
    hv = vdim // heads
    keys = iter(jax.random.split(key, 16 + 16 * layers))

    def rnd(shape, scale):
        return jax.random.normal(next(keys), shape, dtype=jnp.float32) * scale

    gammas = 1.0 - np.exp(np.linspace(np.log(1.0 / 32.0),
                                      np.log(1.0 / 512.0), heads))
    p = {
        "heads": heads,
        "gammas": tuple(float(g) for g in gammas),
        "cp_w": rnd((enc_in, d_model), 0.05), "cp_b": rnd((d_model,), 0.05),
        "cpi_w1": rnd((d_model, d_model), 0.05), "cpi_b1": rnd((d_model,), 0.05),
        "cpi_w2": rnd((d_model, enc_in), 0.05), "cpi_b2": rnd((enc_in,), 0.05),
        "tp_w1": rnd((seq_len, d_ff), 0.05), "tp_b1": rnd((d_ff,), 0.05),
        "tp_w2": rnd((d_ff, pred_len), 0.05), "tp_b2": rnd((pred_len,), 0.05),
        "layers": [],
    }
    for _ in range(layers):
        lp = {
            "wq": rnd((d_model, heads * hd), 1.0 / d_model),
            "wk": rnd((d_model, heads * hd), 1.0 / d_model),
            "wv": rnd((d_model, heads * hv), 1.0 / d_model),
            "wg": rnd((d_model, vdim), 1.0 / d_model),
            "wo": rnd((vdim, d_model), 1.0 / d_model),
            "gn_w": jnp.ones((vdim,), jnp.float32),
            "gn_b": jnp.zeros((vdim,), jnp.float32),
            "ln1_w": jnp.ones((d_model,), jnp.float32),
            "ln1_b": jnp.zeros((d_model,), jnp.float32),
            "ln2_w": jnp.ones((d_model,), jnp.float32),
            "ln2_b": jnp.zeros((d_model,), jnp.float32),
            "ffn_w1": rnd((d_model, d_ff), 0.05), "ffn_b1": rnd((d_ff,), 0.05),
            "ffn_w2": rnd((d_ff, d_model), 0.05), "ffn_b2": rnd((d_model,), 0.05),
        }
        p["layers"].append(lp)
    return p


def forward(params, X, batch_x_mark=None, dec_inp=None, batch_y_mark=None):
    x = channel_proj(X, params["cp_w"], params["cp_b"])
    for lp in params["layers"]:
        x = encoder_layer(x, lp, params["heads"], params["gammas"])
    return tail_proj(x, params)


# ---------------------------------------------------------------------------
# Pure-JAX reference (for a correctness spot check in __main__)
# ---------------------------------------------------------------------------
def _reference_forward(params, X):
    heads, gammas = params["heads"], params["gammas"]
    x = _gelu(X @ params["cp_w"] + params["cp_b"])
    B, L, D = x.shape
    n = jnp.arange(L)[:, None]
    m = jnp.arange(L)[None, :]
    for lp in params["layers"]:
        xn = _layernorm(x, lp["ln1_w"], lp["ln1_b"])
        q = xn @ lp["wq"]; k = xn @ lp["wk"]; v = xn @ lp["wv"]
        hd = q.shape[-1] // heads
        hv = v.shape[-1] // heads
        ys = []
        for h in range(heads):
            qh = q[..., h * hd:(h + 1) * hd]
            kh = k[..., h * hd:(h + 1) * hd]
            vh = v[..., h * hv:(h + 1) * hv]
            dm = jnp.where(n >= m,
                           jnp.asarray(gammas[h], jnp.float32) ** (n - m), 0.0)
            s = jnp.einsum('bld,bmd->blm', qh, kh) * dm
            r = jnp.einsum('blm,bmv->blv', s, vh)
            mu = r.mean(-1, keepdims=True)
            var = ((r - mu) ** 2).mean(-1, keepdims=True)
            rn = (r - mu) * jax.lax.rsqrt(var + 1e-5)
            ys.append(rn * lp["gn_w"][h * hv:(h + 1) * hv]
                      + lp["gn_b"][h * hv:(h + 1) * hv])
        Y = jnp.concatenate(ys, -1)
        gate = _swish(xn @ lp["wg"])
        y = (gate * Y) @ lp["wo"] + x
        yn = _layernorm(y, lp["ln2_w"], lp["ln2_b"])
        x = _gelu(yn @ lp["ffn_w1"] + lp["ffn_b1"]) @ lp["ffn_w2"] + lp["ffn_b2"] + y
    h1 = _gelu(x @ params["cpi_w1"] + params["cpi_b1"])
    c = h1 @ params["cpi_w2"] + params["cpi_b2"]
    ct = jnp.transpose(c, (0, 2, 1))
    t1 = _gelu(ct @ params["tp_w1"] + params["tp_b1"])
    t2 = t1 @ params["tp_w2"] + params["tp_b2"]
    return jnp.transpose(t2, (0, 2, 1))


if __name__ == "__main__":
    B, seq_len, enc_in = 2, 8, 7
    d_model, d_ff, n_heads, e_layers, pred_len = 32, 64, 4, 2, 12

    key = jax.random.PRNGKey(0)
    k_params, k_x = jax.random.split(key)
    params = init_params(k_params, enc_in, d_model, d_ff, n_heads,
                         e_layers, seq_len, pred_len)
    X = jax.random.normal(k_x, (B, seq_len, enc_in), dtype=jnp.float32)

    out = forward(params, X)
    out = jax.block_until_ready(out)
    assert out.shape == (B, pred_len, enc_in), out.shape
    assert bool(jnp.all(jnp.isfinite(out)))

    ref = jax.block_until_ready(_reference_forward(params, X))
    np.testing.assert_allclose(np.asarray(out), np.asarray(ref),
                               rtol=2e-2, atol=2e-2)
    print("KERNEL_OK")
</pallas_src>

<mosaic_0001>
module attributes {stable_mosaic.version = 11 : i64} {
  func.func @_proj_kernel(%arg0: i32, %arg1: memref<2x8x7xf32, #tpu.memory_space<vmem>>, %arg2: memref<7x32xf32, #tpu.memory_space<vmem>>, %arg3: memref<1x32xf32, #tpu.memory_space<vmem>>, %arg4: memref<2x8x32xf32, #tpu.memory_space<vmem>>) attributes {dimension_semantics = [#tpu.dimension_semantics<parallel>], iteration_bounds = array<i64: 1>, scalar_prefetch = 0 : i64, scratch_operands = 0 : i64, tpu.core_type = #tpu.core_type<tc>, window_params = [{transform_indices = @transform_0, window_bounds = array<i64: 2, 8, 7>}, {pipeline_mode = #tpu.pipeline_mode<synchronous>, transform_indices = @transform_1, window_bounds = array<i64: 7, 32>}, {pipeline_mode = #tpu.pipeline_mode<synchronous>, transform_indices = @transform_2, window_bounds = array<i64: 1, 32>}, {transform_indices = @transform_3, window_bounds = array<i64: 2, 8, 32>}]} {
    %c0 = arith.constant 0 : index
    %c0_0 = arith.constant 0 : index
    %c0_1 = arith.constant 0 : index
    %0 = vector.load %arg1[%c0, %c0_0, %c0_1] : memref<2x8x7xf32, #tpu.memory_space<vmem>>, vector<2x8x7xf32>
    %1 = vector.shape_cast %0 : vector<2x8x7xf32> to vector<16x7xf32>
    %c0_2 = arith.constant 0 : index
    %c0_3 = arith.constant 0 : index
    %2 = vector.load %arg2[%c0_2, %c0_3] : memref<7x32xf32, #tpu.memory_space<vmem>>, vector<7x32xf32>
    %cst = arith.constant dense<0.000000e+00> : vector<16x32xf32>
    %3 = tpu.matmul %1, %2, %cst {dimension_numbers = #tpu.dot_dimension_numbers<[1], [0], [0], [1], [0, 0, 1, 1], [], []>} : vector<16x7xf32>, vector<7x32xf32>, vector<16x32xf32> -> vector<16x32xf32>
    %c0_4 = arith.constant 0 : index
    %c0_5 = arith.constant 0 : index
    %4 = vector.load %arg3[%c0_4, %c0_5] : memref<1x32xf32, #tpu.memory_space<vmem>>, vector<1x32xf32>
    %5 = vector.broadcast %4 : vector<1x32xf32> to vector<16x32xf32>
    %6 = arith.addf %3, %5 : vector<16x32xf32>
    %cst_6 = arith.constant 5.000000e-01 : f32
    %7 = vector.broadcast %cst_6 : f32 to vector<16x32xf32>
    %8 = arith.mulf %7, %6 : vector<16x32xf32>
    %cst_7 = arith.constant 0.707106769 : f32
    %9 = vector.broadcast %cst_7 : f32 to vector<16x32xf32>
    %10 = arith.mulf %6, %9 : vector<16x32xf32>
    %11 = math.erf %10 : vector<16x32xf32>
    %cst_8 = arith.constant 1.000000e+00 : f32
    %12 = vector.broadcast %cst_8 : f32 to vector<16x32xf32>
    %13 = arith.addf %12, %11 : vector<16x32xf32>
    %14 = arith.mulf %8, %13 : vector<16x32xf32>
    %15 = vector.shape_cast %14 : vector<16x32xf32> to vector<2x8x32xf32>
    %c0_9 = arith.constant 0 : index
    %c0_10 = arith.constant 0 : index
    %c0_11 = arith.constant 0 : index
    %16 = vector.load %arg4[%c0_9, %c0_10, %c0_11] : memref<2x8x32xf32, #tpu.memory_space<vmem>>, vector<2x8x32xf32>
    tpu.vector_store %arg4[%c0_9, %c0_10, %c0_11], %15 {strides = array<i32>} : memref<2x8x32xf32, #tpu.memory_space<vmem>>, vector<2x8x32xf32>,
    return
  }
  func.func @transform_0(%arg0: i32) -> (i32, i32, i32) {
    %c0_i32 = arith.constant 0 : i32
    %c0_i32_0 = arith.constant 0 : i32
    %c0_i32_1 = arith.constant 0 : i32
    return %arg0, %c0_i32, %c0_i32_0 : i32, i32, i32
  }
  func.func @transform_1(%arg0: i32) -> (i32, i32) {
    %c0_i32 = arith.constant 0 : i32
    %c0_i32_0 = arith.constant 0 : i32
    %c0_i32_1 = arith.constant 0 : i32
    return %c0_i32, %c0_i32_0 : i32, i32
  }
  func.func @transform_2(%arg0: i32) -> (i32, i32) {
    %c0_i32 = arith.constant 0 : i32
    %c0_i32_0 = arith.constant 0 : i32
    %c0_i32_1 = arith.constant 0 : i32
    return %c0_i32, %c0_i32_0 : i32, i32
  }
  func.func @transform_3(%arg0: i32) -> (i32, i32, i32) {
    %c0_i32 = arith.constant 0 : i32
    %c0_i32_0 = arith.constant 0 : i32
    %c0_i32_1 = arith.constant 0 : i32
    return %arg0, %c0_i32, %c0_i32_0 : i32, i32, i32
  }
}

</mosaic_0001>

<bundles_post_ra>
// kernel: tpu_custom_call.1
= control target key start
LH: loop header
LB: loop body
LE: loop exit
PB: predicated region body
PF: predicated region fallthrough
CT: control target
= control target key end

     0   :  { %vm29_vm0 = vcmask 1046528   ;;  %vm22_vm1 = vcmask 56320   ;;  %s261_s0 = inlined_call_operand.vmem [shape: f32[2,8,7], index: 0, kind: input, shape index: {}]   ;;  %s262_s1 = inlined_call_operand.vmem [shape: f32[7,32], index: 1, kind: input, shape index: {}]   ;;  %s263_s2 = inlined_call_operand.vmem [shape: f32[1,32], index: 2, kind: input, shape index: {}]   ;;  %s264_s3 = inlined_call_operand.hbm [shape: f32[2,8,32], index: 3, kind: output, shape index: {}]  }
   0x1   :  { %v17_v0 = vld [vmem:[%s262_s1] sm:$0x7f]  ;;  %v16_v2 = vld [vmem:[%s261_s0 + $0x8] sm:$0xff] }
   0x2   :  { %v15_v1 = vld [vmem:[%s261_s0] sm:$0xff]  ;;  %165 = vmatpush.msk.msra.mxu0 %vm29_vm0, %v17_v0  ;;  %170 = vmatpush.msk.msra.mxu1 %vm29_vm0, %v17_v0 }
   0x3   :  { %8 = vsyncpa [#allocation3], 0  ;;  %166 = vmatmul.msk.f32.vlgmr.msra.gmra.mxu0 %vm22_vm1, %v15_v1  ;;  %167 = vmatmul.msk.f32.vlgmr.msra.gmra.mxu1 %vm22_vm1, %v16_v2  ;;  %v174_v3 = vld [vmem:[%s263_s2] ss:$0 sm:$0xff]  ;;  %s205_s0 = smov [#allocation2]   ;;  %s153_s21 = sshll.u32 %s264_s3, 4  ;;  %s154_s21 = int_to_ptr.hbm [resolvable:$true] %s153_s21 }
   0x4   :  { %s151_s1 = sshll.u32 %s205_s0, 4  ;;  %vm144_vm10 = vcmask 261120   ;;  %s206_s22 = smov 128   ;;  %s152_s1 = int_to_ptr.vmem [resolvable:$true] %s151_s1 }
   0x5   :  { %s207_s23 = smov 8  }
  0x80   :  { %v50_v4 = vpop.f32.mrf.mxu0  ;;  %v53_v5 = vpop.f32.mrf.mxu1 }
  0x81   :  { %v240_v6 = vadd.f32 %v174_v3, %v50_v4  ;;  %v242_v7 = vadd.f32 %v174_v3, %v53_v5 }
  0x83   :  { %v245_v8 = vmul.f32 0.70710677, %v240_v6  ;;  %v248_v9 = vmul.f32 0.70710677, %v242_v7 }
  0x85   :  { %v60_v10 = vmul.f32 %v245_v8, %v245_v8  ;;  %v100_v11 = vmul.f32 %v248_v9, %v248_v9 }
  0x87   :  { %v61_v12 = vmin.f32 %v60_v10, 16.0  ;;  %v101_v13 = vmin.f32 %v100_v11, 16.0 }
  0x89   :  { %v62_v14 = vmul.f32 2.1237322e-06, %v61_v12  ;;  %v73_v15 = vmul.f32 3.8918573e-05, %v61_v12  ;;  %v102_v16 = vmul.f32 2.1237322e-06, %v101_v13 }
  0x8a   :  { %v113_v17 = vmul.f32 3.8918573e-05, %v101_v13 }
  0x8b   :  { %v63_v18 = vadd.f32 0.00028619796, %v62_v14  ;;  %v74_v19 = vadd.f32 0.001143296, %v73_v15  ;;  %v103_v20 = vadd.f32 0.00028619796, %v102_v16 }
  0x8c   :  { %v114_v21 = vadd.f32 0.001143296, %v113_v17 }
  0x8d   :  { %v64_v22 = vmul.f32 %v63_v18, %v61_v12  ;;  %v75_v23 = vmul.f32 %v74_v19, %v61_v12  ;;  %v104_v24 = vmul.f32 %v103_v20, %v101_v13 }
  0x8e   :  { %v115_v25 = vmul.f32 %v114_v21, %v101_v13  ;;  %v57_v21 = vmul.f32 0.5, %v242_v7 }
  0x8f   :  { %v65_v26 = vadd.f32 0.0036580483, %v64_v22  ;;  %v76_v27 = vadd.f32 0.014752088, %v75_v23  ;;  %v105_v30 = vadd.f32 0.0036580483, %v104_v24 }
  0x90   :  { %v116_v28 = vadd.f32 0.014752088, %v115_v25 }
  0x91   :  { %v77_v29 = vmul.f32 %v76_v27, %v61_v12  ;;  %v66_v32 = vmul.f32 %v65_v26, %v61_v12  ;;  %v106_v36 = vmul.f32 %v105_v30, %v101_v13 }
  0x92   :  { %v117_v31 = vmul.f32 %v116_v28, %v101_v13 }
  0x93   :  { %v78_v33 = vadd.f32 0.112945676, %v77_v29  ;;  %v67_v38 = vadd.f32 0.05243302, %v66_v32  ;;  %v107_v42 = vadd.f32 0.05243302, %v106_v36 }
  0x94   :  { %v118_v34 = vadd.f32 0.112945676, %v117_v31 }
  0x95   :  { %v79_v35 = vmul.f32 %v78_v33, %v61_v12  ;;  %v68_v44 = vmul.f32 %v67_v38, %v61_v12  ;;  %v108_v47 = vmul.f32 %v107_v42, %v101_v13 }
  0x96   :  { %v119_v37 = vmul.f32 %v118_v34, %v101_v13 }
  0x97   :  { %v80_v39 = vadd.f32 0.4994258, %v79_v35  ;;  %v69_v48 = vadd.f32 0.18741608, %v68_v44  ;;  %v109_v49 = vadd.f32 0.18741608, %v108_v47 }
  0x98   :  { %v120_v40 = vadd.f32 0.4994258, %v119_v37 }
  0x99   :  { %v81_v41 = vmul.f32 %v80_v39, %v61_v12  ;;  %v70_v51 = vmul.f32 %v69_v48, %v61_v12  ;;  %v110_v54 = vmul.f32 %v109_v49, %v101_v13 }
  0x9a   :  { %v121_v43 = vmul.f32 %v120_v40, %v101_v13 }
  0x9b   :  { %v82_v45 = vadd.f32 1.0, %v81_v41  ;;  %v71_v57 = vadd.f32 1.1283791, %v70_v51  ;;  %v111_v63 = vadd.f32 1.1283791, %v110_v54 }
  0x9c   :  { %v122_v46 = vadd.f32 1.0, %v121_v43 }
  0x9d   :  { %175 = vrcp.f32 %v82_v45  ;;  %v94_v58 = vand.u32 2147483648, %v82_v45  ;;  %v92_v61 = vand.u32 2147483647, %v82_v45  ;;  %vm88_vm4 = vweird.f32 %v82_v45 }
  0x9e   :  { %177 = vrcp.f32 %v122_v46  ;;  %v134_v62 = vand.u32 2147483648, %v122_v46  ;;  %v132_v1 = vand.u32 2147483647, %v122_v46  ;;  %vm128_vm6 = vweird.f32 %v122_v46 }
  0x9f   :  { %v95_v3 = vor.u32 1.1754944e-38, %v94_v58  ;;  %v72_v5 = vmul.f32 %v71_v57, %v245_v8  ;;  %vm93_vm7 = vcmp.eq.f32.partialorder %v92_v61, 8.507059e+37  ;;  %v112_v13 = vmul.f32 %v111_v63, %v248_v9 }
  0xa0   :  { %v135_v11 = vor.u32 1.1754944e-38, %v134_v62  ;;  %vm133_vm9 = vcmp.eq.f32.partialorder %v132_v1, 8.507059e+37  ;;  %v56_v8 = vmul.f32 0.5, %v240_v6 }
  0xa3   :  { %v176_v50 = vpop.eup %175 }
  0xa4   :  { %v178_v52 = vpop.eup %177  ;;  %v84_v53 = vmul.f32 %v176_v50, %v82_v45  ;;  %vm89_vm2 = vweird.f32 %v176_v50 }
  0xa5   :  { %v124_v55 = vmul.f32 %v178_v52, %v122_v46  ;;  %vm129_vm3 = vweird.f32 %v178_v52  ;;  %vm90_vm5 = vmor %vm88_vm4, %vm89_vm2 }
  0xa6   :  { %v85_v56 = vsub.f32 1.0, %v84_v53  ;;  %vm130_vm8 = vmor %vm128_vm6, %vm129_vm3 }
  0xa7   :  { %v125_v59 = vsub.f32 1.0, %v124_v55 }
  0xa8   :  { %v86_v60 = vmul.f32 %v176_v50, %v85_v56 }
  0xa9   :  { %v126_v0 = vmul.f32 %v178_v52, %v125_v59 }
  0xaa   :  { %v87_v2 = vadd.f32 %v176_v50, %v86_v60 }
  0xab   :  { %v127_v4 = vadd.f32 %v178_v52, %v126_v0 }
  0xac   :  { %v91_v10 = vsel %vm90_vm5, %v176_v50, %v87_v2 }
  0xad   :  { %v96_v12 = vsel %vm93_vm7, %v95_v3, %v91_v10  ;;  %v131_v14 = vsel %vm130_vm8, %v178_v52, %v127_v4 }
  0xae   :  { %v97_v15 = vmul.f32 %v96_v12, %v72_v5  ;;  %v136_v16 = vsel %vm133_vm9, %v135_v11, %v131_v14 }
  0xaf   :  { %v137_v17 = vmul.f32 %v136_v16, %v112_v13 }
  0xb0   :  { %v168_v18 = vclamps-f32 %v97_v15, 1.0 }
  0xb1   :  { %v169_v19 = vclamps-f32 %v137_v17, 1.0 }
  0xb2   :  { %v140_v20 = vadd.f32 1.0, %v168_v18 }
  0xb3   :  { %v141_v9 = vadd.f32 1.0, %v169_v19 }
  0xb4   :  { %v142_v22 = vmul.f32 %v140_v20, %v56_v8 }
  0xb5   :  { %v143_v23 = vmul.f32 %v141_v9, %v57_v21 }
  0xb6   :  { %145 = vst.msk [vmem:[#allocation2] sm:$0xff] %vm144_vm10, %v142_v22 }
  0xb7   :  { %146 = vst.msk [vmem:[#allocation2 + $0x8] sm:$0xff] %vm144_vm10, %v143_v23 }
  0xb8   :  { %159 = dma.vmem_to_hbm [thread:$0]  %s152_s1, 256, %s154_s21, [#allocation3], %s206_s22, %s206_s22, %s207_s23  }
  0xb9   :  { %203 = dma.done.wait [#allocation3], 256  }
  0xba   :  { %204 = vsyncadd [#allocation3], 4294967040 }
  0xbb   :  { %164 = vsyncpa [#allocation3], 1 }

</bundles_post_ra>
